<compile_context>
chip_gen: v7x
topology: tpu7x:2x2x1
jax: 0.10.0
libtpu: 0.0.40
codegen_flags: <defaults>
</compile_context>

<pallas_src>
import jax
import jax.numpy as jnp
from jax import lax
from jax.experimental import pallas as pl
from jax.experimental.pallas import tpu as pltpu

OUT_PAD = 128  # lane-dense logits slab width (real logits live in cols 0..1)


# ----------------------------- kernel -------------------------------------

def siamese_kernel(x1_ref, m1_ref, x2_ref, m2_ref,
                   webd_ref, w1_ref, b1_ref, wh_ref, bh_ref, w2_ref, b2_ref,
                   out_ref):
    bf16 = jnp.bfloat16

    # Masked token-sums on the RAW features (pooling commutes with the linear
    # stub encoders).  The mean denominator is a positive per-row scalar that
    # the L2 normalization below cancels exactly (zero-mask rows still give 0).
    p1 = jnp.sum(x1_ref[...] * m1_ref[...], axis=1)        # [BB, F] f32
    p2 = jnp.sum(x2_ref[...] * m2_ref[...], axis=1)        # [BB, F] f32
    pooled = jnp.concatenate([p1, p2], axis=-1)             # [BB, 2F] f32

    # Single fused block-diagonal projection for both encoders (weights bf16,
    # pre-scaled by 1/S in the wrapper).
    e = jnp.dot(pooled.astype(bf16), webd_ref[...],
                preferred_element_type=jnp.float32)          # [BB, 2H] f32

    # Per-half L2 normalization (F.normalize(p=2, dim=1) for each encoder).
    two_h = e.shape[1]
    h_dim = two_h // 2
    left = lax.broadcasted_iota(jnp.int32, (1, two_h), 1) < h_dim   # [1, 2H]
    sq = e * e
    n1 = jnp.sum(jnp.where(left, sq, 0.0), axis=1, keepdims=True)   # [BB, 1]
    n2 = jnp.sum(jnp.where(left, 0.0, sq), axis=1, keepdims=True)   # [BB, 1]
    inv = jnp.where(left,
                    lax.rsqrt(jnp.maximum(n1, 1e-24)),
                    lax.rsqrt(jnp.maximum(n2, 1e-24)))               # [BB, 2H]
    e = e * inv                                                      # normalized cat

    # --- classifier on cat([e1, e2], dim=1) --------------------------------
    h = jnp.dot(e.astype(bf16), w1_ref[...],
                preferred_element_type=jnp.float32) + b1_ref[...]    # fc1
    h = jnp.maximum(h, 0.0)                                          # ReLU

    h = jnp.dot(h.astype(bf16), wh_ref[...],
                preferred_element_type=jnp.float32) + bh_ref[...]    # hidden (x1)
    h = jnp.maximum(h, 0.0)

    logits = jnp.dot(h.astype(bf16), w2_ref[...],
                     preferred_element_type=jnp.float32) + b2_ref[...]
    out_ref[...] = logits.astype(out_ref.dtype)                      # [BB, 128]


# ----------------------------- wrapper -------------------------------------

def siamese_forward(x_feats, x_mask, y_feats, y_mask, params, *, batch_block=None):
    B, S, F = x_feats.shape
    we1, we2, w1, b1, wh, bh, w2, b2 = params
    H = we1.shape[1]
    HLS = w1.shape[1]
    n_cls = w2.shape[1]
    bf16 = jnp.bfloat16

    # Fused block-diagonal encoder projection [2F, 2H]; fold constant 1/S into
    # the weights (exact under L2 normalize, keeps bf16 operands well scaled).
    inv_s = jnp.float32(1.0 / S)
    we_bd = jnp.zeros((2 * F, 2 * H), jnp.float32)
    we_bd = we_bd.at[:F, :H].set(we1 * inv_s).at[F:, H:].set(we2 * inv_s)
    we_bd = we_bd.astype(bf16)

    # Cast weights to bf16 once in the wrapper; biases stay f32.
    w1b = w1.astype(bf16)
    whb = wh.astype(bf16)
    w2p = jnp.zeros((HLS, OUT_PAD), jnp.float32).at[:, :n_cls].set(w2).astype(bf16)
    b2p = jnp.zeros((1, OUT_PAD), jnp.float32).at[:, :n_cls].set(b2)

    # Masks as [B, S, 1]: the in-kernel multiply is a plain broadcast.
    xm = x_mask[:, :, None].astype(jnp.float32)
    ym = y_mask[:, :, None].astype(jnp.float32)

    # Largest batch block (ideally the whole batch) that keeps the
    # double-buffered [BB, S, F] feature tiles inside the VMEM budget.
    if batch_block is None:
        BB = B if B <= 128 else 128
        while B % BB:
            BB -= 1
    else:
        BB = min(batch_block, B)
    assert B % BB == 0, "batch must be divisible by the batch block"
    grid = (B // BB,)

    feat_map = lambda b: (b, 0, 0)
    row_map = lambda b: (b, 0)
    fixed2 = lambda b: (0, 0)

    in_specs = [
        pl.BlockSpec((BB, S, F), feat_map),     # x_feats
        pl.BlockSpec((BB, S, 1), feat_map),     # x_mask (broadcast-ready)
        pl.BlockSpec((BB, S, F), feat_map),     # y_feats
        pl.BlockSpec((BB, S, 1), feat_map),     # y_mask
        pl.BlockSpec(we_bd.shape, fixed2),      # fused encoder projection (bf16)
        pl.BlockSpec(w1b.shape, fixed2),        # fc1 (bf16)
        pl.BlockSpec(b1.shape, fixed2),         # fc1 bias (f32)
        pl.BlockSpec(whb.shape, fixed2),        # hidden layer (bf16)
        pl.BlockSpec(bh.shape, fixed2),         # hidden bias (f32)
        pl.BlockSpec(w2p.shape, fixed2),        # fc2 padded (bf16)
        pl.BlockSpec(b2p.shape, fixed2),        # fc2 bias padded (f32)
    ]
    out_spec = pl.BlockSpec((BB, OUT_PAD), row_map)

    # Advisory cost hint for the XLA scheduler.
    flops = int(
        4 * B * S * F                   # two masked sums
        + 2 * B * (2 * F) * (2 * H)     # fused encoder projection
        + 2 * B * (2 * H) * HLS         # fc1
        + 2 * B * HLS * HLS             # hidden layer
        + 2 * B * HLS * OUT_PAD         # fc2 (padded)
    )
    transcendentals = int(2 * B)        # one rsqrt per row per encoder
    operands = (x_feats, xm, y_feats, ym, we_bd, w1b, b1, whb, bh, w2p, b2p)
    bytes_accessed = int(sum(a.size * a.dtype.itemsize for a in operands)
                         + B * OUT_PAD * 4)

    out_padded = pl.pallas_call(
        siamese_kernel,
        out_shape=jax.ShapeDtypeStruct((B, OUT_PAD), jnp.float32),
        grid=grid,
        in_specs=in_specs,
        out_specs=out_spec,
        compiler_params=pltpu.CompilerParams(
            dimension_semantics=("parallel",),
            vmem_limit_bytes=32 * 1024 * 1024,
        ),
        cost_estimate=pl.CostEstimate(
            flops=flops,
            transcendentals=transcendentals,
            bytes_accessed=bytes_accessed,
        ),
    )(*operands)

    return out_padded[:, :n_cls]


# ----------------------------- params --------------------------------------

def init_params(key, feat, hid, hls):
    """Deterministic PyTorch-Linear-style init (uniform +-1/sqrt(fan_in))."""
    ks = jax.random.split(key, 10)

    def lin(k, fan_in, shape):
        bound = 1.0 / jnp.sqrt(jnp.float32(fan_in))
        return jax.random.uniform(k, shape, jnp.float32, -bound, bound)

    we1 = lin(ks[0], feat, (feat, hid))          # encoder1 stub projection
    we2 = lin(ks[1], feat, (feat, hid))          # encoder2 stub projection
    w1  = lin(ks[2], 2 * hid, (2 * hid, hls))    # Classifier.fc1 (input = 2H)
    b1  = lin(ks[3], 2 * hid, (1, hls))
    wh  = lin(ks[4], hls, (hls, hls))            # one hidden layer
    bh  = lin(ks[5], hls, (1, hls))
    w2  = lin(ks[6], hls, (hls, 2))              # Classifier.fc2
    b2  = lin(ks[7], hls, (1, 2))
    return (we1, we2, w1, b1, wh, bh, w2, b2)


# ----------------------------- reference ------------------------------------

def siamese_reference(x_feats, x_mask, y_feats, y_mask, params):
    """Pure-JAX f32 reference following the PyTorch forward semantics."""
    we1, we2, w1, b1, wh, bh, w2, b2 = params

    def embed(x, m, we):
        tok = jnp.einsum('bsf,fh->bsh', x, we)                     # stub encoder
        mexp = m[:, :, None]
        pooled = jnp.sum(tok * mexp, axis=1) / jnp.clip(
            jnp.sum(mexp, axis=1), 1e-9, None)                     # mean_pooling
        norm = jnp.sqrt(jnp.sum(pooled * pooled, axis=1, keepdims=True))
        return pooled / jnp.maximum(norm, 1e-12)                   # F.normalize

    e = jnp.concatenate([embed(x_feats, x_mask, we1),
                         embed(y_feats, y_mask, we2)], axis=1)
    h = jnp.maximum(e @ w1 + b1, 0.0)
    h = jnp.maximum(h @ wh + bh, 0.0)
    return h @ w2 + b2


# ----------------------------- demo ----------------------------------------

if __name__ == "__main__":
    # batch, seq, feat, embed dim, hidden_layer_size
    B, S, F, H, HLS = 16, 8, 16, 32, 32

    key = jax.random.PRNGKey(0)
    k_x, k_y, k_p = jax.random.split(key, 3)

    x_feats = jax.random.normal(k_x, (B, S, F), jnp.float32)
    y_feats = jax.random.normal(k_y, (B, S, F), jnp.float32)

    # deterministic attention masks with some padding positions
    lengths_x = (jnp.arange(B, dtype=jnp.int32) % S) + 1
    lengths_y = ((jnp.arange(B, dtype=jnp.int32) * 3) % S) + 1
    pos = jnp.arange(S, dtype=jnp.int32)[None, :]
    x_mask = (pos < lengths_x[:, None]).astype(jnp.float32)   # [B, S]
    y_mask = (pos < lengths_y[:, None]).astype(jnp.float32)   # [B, S]

    params = init_params(k_p, F, H, HLS)

    out = siamese_forward(x_feats, x_mask, y_feats, y_mask, params)
    jax.block_until_ready(out)
    assert out.shape == (B, 2) and out.dtype == jnp.float32

    ref = siamese_reference(x_feats, x_mask, y_feats, y_mask, params)
    assert jnp.allclose(out, ref, atol=3e-2, rtol=3e-2), (
        f"max abs err {float(jnp.max(jnp.abs(out - ref)))}")

    print("KERNEL_OK")
</pallas_src>

<mosaic_0001>
module attributes {stable_mosaic.version = 11 : i64} {
  func.func @siamese_kernel(%arg0: i32, %arg1: memref<16x8x16xf32, #tpu.memory_space<vmem>>, %arg2: memref<16x8x1xf32, #tpu.memory_space<vmem>>, %arg3: memref<16x8x16xf32, #tpu.memory_space<vmem>>, %arg4: memref<16x8x1xf32, #tpu.memory_space<vmem>>, %arg5: memref<32x64xbf16, #tpu.memory_space<vmem>>, %arg6: memref<64x32xbf16, #tpu.memory_space<vmem>>, %arg7: memref<1x32xf32, #tpu.memory_space<vmem>>, %arg8: memref<32x32xbf16, #tpu.memory_space<vmem>>, %arg9: memref<1x32xf32, #tpu.memory_space<vmem>>, %arg10: memref<32x128xbf16, #tpu.memory_space<vmem>>, %arg11: memref<1x128xf32, #tpu.memory_space<vmem>>, %arg12: memref<16x128xf32, #tpu.memory_space<vmem>>) attributes {dimension_semantics = [#tpu.dimension_semantics<parallel>], iteration_bounds = array<i64: 1>, scalar_prefetch = 0 : i64, scratch_operands = 0 : i64, tpu.core_type = #tpu.core_type<tc>, window_params = [{transform_indices = @transform_0, window_bounds = array<i64: 16, 8, 16>}, {transform_indices = @transform_1, window_bounds = array<i64: 16, 8, 1>}, {transform_indices = @transform_2, window_bounds = array<i64: 16, 8, 16>}, {transform_indices = @transform_3, window_bounds = array<i64: 16, 8, 1>}, {pipeline_mode = #tpu.pipeline_mode<synchronous>, transform_indices = @transform_4, window_bounds = array<i64: 32, 64>}, {pipeline_mode = #tpu.pipeline_mode<synchronous>, transform_indices = @transform_5, window_bounds = array<i64: 64, 32>}, {pipeline_mode = #tpu.pipeline_mode<synchronous>, transform_indices = @transform_6, window_bounds = array<i64: 1, 32>}, {pipeline_mode = #tpu.pipeline_mode<synchronous>, transform_indices = @transform_7, window_bounds = array<i64: 32, 32>}, {pipeline_mode = #tpu.pipeline_mode<synchronous>, transform_indices = @transform_8, window_bounds = array<i64: 1, 32>}, {pipeline_mode = #tpu.pipeline_mode<synchronous>, transform_indices = @transform_9, window_bounds = array<i64: 32, 128>}, {pipeline_mode = #tpu.pipeline_mode<synchronous>, transform_indices = @transform_10, window_bounds = array<i64: 1, 128>}, {transform_indices = @transform_11, window_bounds = array<i64: 16, 128>}]} {
    %c0 = arith.constant 0 : index
    %c0_0 = arith.constant 0 : index
    %c0_1 = arith.constant 0 : index
    %0 = vector.load %arg1[%c0, %c0_0, %c0_1] : memref<16x8x16xf32, #tpu.memory_space<vmem>>, vector<16x8x16xf32>
    %c0_2 = arith.constant 0 : index
    %c0_3 = arith.constant 0 : index
    %c0_4 = arith.constant 0 : index
    %1 = vector.load %arg2[%c0_2, %c0_3, %c0_4] : memref<16x8x1xf32, #tpu.memory_space<vmem>>, vector<16x8x1xf32>
    %2 = vector.broadcast %1 : vector<16x8x1xf32> to vector<16x8x16xf32>
    %3 = arith.mulf %0, %2 : vector<16x8x16xf32>
    %cst = arith.constant dense<0.000000e+00> : vector<16x16xf32>
    %4 = vector.multi_reduction <add>, %3, %cst [1] : vector<16x8x16xf32> to vector<16x16xf32>
    %c0_5 = arith.constant 0 : index
    %c0_6 = arith.constant 0 : index
    %c0_7 = arith.constant 0 : index
    %5 = vector.load %arg3[%c0_5, %c0_6, %c0_7] : memref<16x8x16xf32, #tpu.memory_space<vmem>>, vector<16x8x16xf32>
    %c0_8 = arith.constant 0 : index
    %c0_9 = arith.constant 0 : index
    %c0_10 = arith.constant 0 : index
    %6 = vector.load %arg4[%c0_8, %c0_9, %c0_10] : memref<16x8x1xf32, #tpu.memory_space<vmem>>, vector<16x8x1xf32>
    %7 = vector.broadcast %6 : vector<16x8x1xf32> to vector<16x8x16xf32>
    %8 = arith.mulf %5, %7 : vector<16x8x16xf32>
    %cst_11 = arith.constant dense<0.000000e+00> : vector<16x16xf32>
    %9 = vector.multi_reduction <add>, %8, %cst_11 [1] : vector<16x8x16xf32> to vector<16x16xf32>
    %10 = tpu.concatenate %4, %9 in 1 : vector<16x16xf32>, vector<16x16xf32> -> vector<16x32xf32>
    %11 = arith.truncf %10 : vector<16x32xf32> to vector<16x32xbf16>
    %c0_12 = arith.constant 0 : index
    %c0_13 = arith.constant 0 : index
    %12 = vector.load %arg5[%c0_12, %c0_13] : memref<32x64xbf16, #tpu.memory_space<vmem>>, vector<32x64xbf16>
    %cst_14 = arith.constant dense<0.000000e+00> : vector<16x64xf32>
    %13 = tpu.matmul %11, %12, %cst_14 {dimension_numbers = #tpu.dot_dimension_numbers<[1], [0], [0], [1], [0, 0, 1, 1], [], []>} : vector<16x32xbf16>, vector<32x64xbf16>, vector<16x64xf32> -> vector<16x64xf32>
    %14 = tpu.iota {dimensions = array<i32: 1>} : vector<1x64xi32>
    %c32_i32 = arith.constant 32 : i32
    %15 = vector.broadcast %c32_i32 : i32 to vector<1x64xi32>
    %16 = arith.cmpi slt, %14, %15 : vector<1x64xi32>
    %17 = arith.mulf %13, %13 : vector<16x64xf32>
    %cst_15 = arith.constant 0.000000e+00 : f32
    %18 = vector.shape_cast %16 : vector<1x64xi1> to vector<1x64xi1>
    %19 = vector.broadcast %18 : vector<1x64xi1> to vector<16x64xi1>
    %20 = vector.broadcast %cst_15 : f32 to vector<16x64xf32>
    %21 = arith.select %19, %17, %20 : vector<16x64xi1>, vector<16x64xf32>
    %cst_16 = arith.constant dense<0.000000e+00> : vector<16xf32>
    %22 = vector.multi_reduction <add>, %21, %cst_16 [1] : vector<16x64xf32> to vector<16xf32>
    %23 = vector.shape_cast %22 : vector<16xf32> to vector<16x1xf32>
    %cst_17 = arith.constant 0.000000e+00 : f32
    %24 = vector.shape_cast %16 : vector<1x64xi1> to vector<1x64xi1>
    %25 = vector.broadcast %24 : vector<1x64xi1> to vector<16x64xi1>
    %26 = vector.broadcast %cst_17 : f32 to vector<16x64xf32>
    %27 = arith.select %25, %26, %17 : vector<16x64xi1>, vector<16x64xf32>
    %cst_18 = arith.constant dense<0.000000e+00> : vector<16xf32>
    %28 = vector.multi_reduction <add>, %27, %cst_18 [1] : vector<16x64xf32> to vector<16xf32>
    %29 = vector.shape_cast %28 : vector<16xf32> to vector<16x1xf32>
    %cst_19 = arith.constant 1.000000e-24 : f32
    %30 = vector.broadcast %cst_19 : f32 to vector<16x1xf32>
    %31 = arith.maximumf %23, %30 : vector<16x1xf32>
    %32 = math.rsqrt %31 : vector<16x1xf32>
    %cst_20 = arith.constant 1.000000e-24 : f32
    %33 = vector.broadcast %cst_20 : f32 to vector<16x1xf32>
    %34 = arith.maximumf %29, %33 : vector<16x1xf32>
    %35 = math.rsqrt %34 : vector<16x1xf32>
    %36 = vector.shape_cast %16 : vector<1x64xi1> to vector<1x64xi1>
    %37 = vector.broadcast %36 : vector<1x64xi1> to vector<16x64xi1>
    %38 = vector.shape_cast %32 : vector<16x1xf32> to vector<16x1xf32>
    %39 = vector.broadcast %38 : vector<16x1xf32> to vector<16x64xf32>
    %40 = vector.shape_cast %35 : vector<16x1xf32> to vector<16x1xf32>
    %41 = vector.broadcast %40 : vector<16x1xf32> to vector<16x64xf32>
    %42 = arith.select %37, %39, %41 : vector<16x64xi1>, vector<16x64xf32>
    %43 = arith.mulf %13, %42 : vector<16x64xf32>
    %44 = arith.truncf %43 : vector<16x64xf32> to vector<16x64xbf16>
    %c0_21 = arith.constant 0 : index
    %c0_22 = arith.constant 0 : index
    %45 = vector.load %arg6[%c0_21, %c0_22] : memref<64x32xbf16, #tpu.memory_space<vmem>>, vector<64x32xbf16>
    %cst_23 = arith.constant dense<0.000000e+00> : vector<16x32xf32>
    %46 = tpu.matmul %44, %45, %cst_23 {dimension_numbers = #tpu.dot_dimension_numbers<[1], [0], [0], [1], [0, 0, 1, 1], [], []>} : vector<16x64xbf16>, vector<64x32xbf16>, vector<16x32xf32> -> vector<16x32xf32>
    %c0_24 = arith.constant 0 : index
    %c0_25 = arith.constant 0 : index
    %47 = vector.load %arg7[%c0_24, %c0_25] : memref<1x32xf32, #tpu.memory_space<vmem>>, vector<1x32xf32>
    %48 = vector.broadcast %47 : vector<1x32xf32> to vector<16x32xf32>
    %49 = arith.addf %46, %48 : vector<16x32xf32>
    %cst_26 = arith.constant 0.000000e+00 : f32
    %50 = vector.broadcast %cst_26 : f32 to vector<16x32xf32>
    %51 = arith.maximumf %49, %50 : vector<16x32xf32>
    %52 = arith.truncf %51 : vector<16x32xf32> to vector<16x32xbf16>
    %c0_27 = arith.constant 0 : index
    %c0_28 = arith.constant 0 : index
    %53 = vector.load %arg8[%c0_27, %c0_28] : memref<32x32xbf16, #tpu.memory_space<vmem>>, vector<32x32xbf16>
    %cst_29 = arith.constant dense<0.000000e+00> : vector<16x32xf32>
    %54 = tpu.matmul %52, %53, %cst_29 {dimension_numbers = #tpu.dot_dimension_numbers<[1], [0], [0], [1], [0, 0, 1, 1], [], []>} : vector<16x32xbf16>, vector<32x32xbf16>, vector<16x32xf32> -> vector<16x32xf32>
    %c0_30 = arith.constant 0 : index
    %c0_31 = arith.constant 0 : index
    %55 = vector.load %arg9[%c0_30, %c0_31] : memref<1x32xf32, #tpu.memory_space<vmem>>, vector<1x32xf32>
    %56 = vector.broadcast %55 : vector<1x32xf32> to vector<16x32xf32>
    %57 = arith.addf %54, %56 : vector<16x32xf32>
    %cst_32 = arith.constant 0.000000e+00 : f32
    %58 = vector.broadcast %cst_32 : f32 to vector<16x32xf32>
    %59 = arith.maximumf %57, %58 : vector<16x32xf32>
    %60 = arith.truncf %59 : vector<16x32xf32> to vector<16x32xbf16>
    %c0_33 = arith.constant 0 : index
    %c0_34 = arith.constant 0 : index
    %61 = vector.load %arg10[%c0_33, %c0_34] : memref<32x128xbf16, #tpu.memory_space<vmem>>, vector<32x128xbf16>
    %cst_35 = arith.constant dense<0.000000e+00> : vector<16x128xf32>
    %62 = tpu.matmul %60, %61, %cst_35 {dimension_numbers = #tpu.dot_dimension_numbers<[1], [0], [0], [1], [0, 0, 1, 1], [], []>} : vector<16x32xbf16>, vector<32x128xbf16>, vector<16x128xf32> -> vector<16x128xf32>
    %c0_36 = arith.constant 0 : index
    %c0_37 = arith.constant 0 : index
    %63 = vector.load %arg11[%c0_36, %c0_37] : memref<1x128xf32, #tpu.memory_space<vmem>>, vector<1x128xf32>
    %64 = vector.broadcast %63 : vector<1x128xf32> to vector<16x128xf32>
    %65 = arith.addf %62, %64 : vector<16x128xf32>
    %c0_38 = arith.constant 0 : index
    %c0_39 = arith.constant 0 : index
    %66 = vector.load %arg12[%c0_38, %c0_39] : memref<16x128xf32, #tpu.memory_space<vmem>>, vector<16x128xf32>
    tpu.vector_store %arg12[%c0_38, %c0_39], %65 {strides = array<i32>} : memref<16x128xf32, #tpu.memory_space<vmem>>, vector<16x128xf32>,
    return
  }
  func.func @transform_0(%arg0: i32) -> (i32, i32, i32) {
    %c0_i32 = arith.constant 0 : i32
    %c0_i32_0 = arith.constant 0 : i32
    %c0_i32_1 = arith.constant 0 : i32
    return %arg0, %c0_i32, %c0_i32_0 : i32, i32, i32
  }
  func.func @transform_1(%arg0: i32) -> (i32, i32, i32) {
    %c0_i32 = arith.constant 0 : i32
    %c0_i32_0 = arith.constant 0 : i32
    %c0_i32_1 = arith.constant 0 : i32
    return %arg0, %c0_i32, %c0_i32_0 : i32, i32, i32
  }
  func.func @transform_2(%arg0: i32) -> (i32, i32, i32) {
    %c0_i32 = arith.constant 0 : i32
    %c0_i32_0 = arith.constant 0 : i32
    %c0_i32_1 = arith.constant 0 : i32
    return %arg0, %c0_i32, %c0_i32_0 : i32, i32, i32
  }
  func.func @transform_3(%arg0: i32) -> (i32, i32, i32) {
    %c0_i32 = arith.constant 0 : i32
    %c0_i32_0 = arith.constant 0 : i32
    %c0_i32_1 = arith.constant 0 : i32
    return %arg0, %c0_i32, %c0_i32_0 : i32, i32, i32
  }
  func.func @transform_4(%arg0: i32) -> (i32, i32) {
    %c0_i32 = arith.constant 0 : i32
    %c0_i32_0 = arith.constant 0 : i32
    %c0_i32_1 = arith.constant 0 : i32
    return %c0_i32, %c0_i32_0 : i32, i32
  }
  func.func @transform_5(%arg0: i32) -> (i32, i32) {
    %c0_i32 = arith.constant 0 : i32
    %c0_i32_0 = arith.constant 0 : i32
    %c0_i32_1 = arith.constant 0 : i32
    return %c0_i32, %c0_i32_0 : i32, i32
  }
  func.func @transform_6(%arg0: i32) -> (i32, i32) {
    %c0_i32 = arith.constant 0 : i32
    %c0_i32_0 = arith.constant 0 : i32
    %c0_i32_1 = arith.constant 0 : i32
    return %c0_i32, %c0_i32_0 : i32, i32
  }
  func.func @transform_7(%arg0: i32) -> (i32, i32) {
    %c0_i32 = arith.constant 0 : i32
    %c0_i32_0 = arith.constant 0 : i32
    %c0_i32_1 = arith.constant 0 : i32
    return %c0_i32, %c0_i32_0 : i32, i32
  }
  func.func @transform_8(%arg0: i32) -> (i32, i32) {
    %c0_i32 = arith.constant 0 : i32
    %c0_i32_0 = arith.constant 0 : i32
    %c0_i32_1 = arith.constant 0 : i32
    return %c0_i32, %c0_i32_0 : i32, i32
  }
  func.func @transform_9(%arg0: i32) -> (i32, i32) {
    %c0_i32 = arith.constant 0 : i32
    %c0_i32_0 = arith.constant 0 : i32
    %c0_i32_1 = arith.constant 0 : i32
    return %c0_i32, %c0_i32_0 : i32, i32
  }
  func.func @transform_10(%arg0: i32) -> (i32, i32) {
    %c0_i32 = arith.constant 0 : i32
    %c0_i32_0 = arith.constant 0 : i32
    %c0_i32_1 = arith.constant 0 : i32
    return %c0_i32, %c0_i32_0 : i32, i32
  }
  func.func @transform_11(%arg0: i32) -> (i32, i32) {
    %c0_i32 = arith.constant 0 : i32
    %c0_i32_0 = arith.constant 0 : i32
    return %arg0, %c0_i32 : i32, i32
  }
}

</mosaic_0001>

<bundles_post_ra>
// kernel: tpu_custom_call.1
= control target key start
LH: loop header
LB: loop body
LE: loop exit
PB: predicated region body
PF: predicated region fallthrough
CT: control target
= control target key end

     0   :  { %v1061_v2 = vmov 0   ;;  %s1489_s0 = inlined_call_operand.vmem [shape: f32[16,8,16], index: 0, kind: input, shape index: {}]   ;;  %s1490_s1 = inlined_call_operand.vmem [shape: f32[16,8,1], index: 1, kind: input, shape index: {}]   ;;  %s1491_s2 = inlined_call_operand.vmem [shape: f32[16,8,16], index: 2, kind: input, shape index: {}]   ;;  %s1492_s3 = inlined_call_operand.vmem [shape: f32[16,8,1], index: 3, kind: input, shape index: {}]   ;;  %s1493_s4 = inlined_call_operand.vmem [shape: bf16[32,64], index: 4, kind: input, shape index: {}]   ;;  %s1494_s5 = inlined_call_operand.vmem [shape: bf16[64,32], index: 5, kind: input, shape index: {}]   ;;  %s1495_s6 = inlined_call_operand.vmem [shape: f32[1,32], index: 6, kind: input, shape index: {}]   ;;  %s1496_s7 = inlined_call_operand.vmem [shape: bf16[32,32], index: 7, kind: input, shape index: {}]   ;;  %s1497_s8 = inlined_call_operand.vmem [shape: f32[1,32], index: 8, kind: input, shape index: {}]   ;;  %s1498_s9 = inlined_call_operand.vmem [shape: bf16[32,128], index: 9, kind: input, shape index: {}]   ;;  %s1499_s10 = inlined_call_operand.vmem [shape: f32[1,128], index: 10, kind: input, shape index: {}]   ;;  %s1500_s11 = inlined_call_operand.hbm [shape: f32[16,128], index: 11, kind: output, shape index: {}]  }
   0x1   :  { %v305_v0 = vld [vmem:[%s1492_s3 + $0x40] sm:$0xff]  ;;  %1013 = vset.pattern.permute.xlu1 %v1061_v2  ;;  %1012 = vset.pattern.permute.xlu0 %v1061_v2  ;;  %v306_v3 = vld [vmem:[%s1492_s3 + $0x48] sm:$0xff]  ;;  %v307_v5 = vld [vmem:[%s1492_s3 + $0x50] sm:$0xff] }
   0x2   :  { %v297_v1 = vld [vmem:[%s1492_s3] sm:$0xff]  ;;  %355 = vperm.xlu1 %1013, %v305_v0   ;;  %v298_v4 = vld [vmem:[%s1492_s3 + $0x8] sm:$0xff]  ;;  %v299_v6 = vld [vmem:[%s1492_s3 + $0x10] sm:$0xff] }
   0x3   :  { %315 = vperm.xlu0 %1012, %v297_v1   ;;  %v308_v7 = vld [vmem:[%s1492_s3 + $0x58] sm:$0xff]  ;;  %v309_v9 = vld [vmem:[%s1492_s3 + $0x60] sm:$0xff]  ;;  %v310_v11 = vld [vmem:[%s1492_s3 + $0x68] sm:$0xff] }
   0x4   :  { %v300_v8 = vld [vmem:[%s1492_s3 + $0x18] sm:$0xff]  ;;  %v301_v10 = vld [vmem:[%s1492_s3 + $0x20] sm:$0xff]  ;;  %v302_v12 = vld [vmem:[%s1492_s3 + $0x28] sm:$0xff] }
   0x6   :  { %360 = vperm.xlu1 %1013, %v306_v3  }
   0x7   :  { %320 = vperm.xlu0 %1012, %v298_v4  }
   0xa   :  { %365 = vperm.xlu1 %1013, %v307_v5  }
   0xb   :  { %325 = vperm.xlu0 %1012, %v299_v6  }
   0xe   :  { %370 = vperm.xlu1 %1013, %v308_v7  }
   0xf   :  { %330 = vperm.xlu0 %1012, %v300_v8  }
  0x12   :  { %375 = vperm.xlu1 %1013, %v309_v9  }
  0x13   :  { %335 = vperm.xlu0 %1012, %v301_v10  }
  0x14   :  { %16 = vsyncpa [#allocation3], 0  ;;  %v311_v13 = vld [vmem:[%s1492_s3 + $0x70] sm:$0xff]  ;;  %v312_v15 = vld [vmem:[%s1492_s3 + $0x78] sm:$0xff]  ;;  %v1062_v34 = vmov 0.0   ;;  %vm168_vm0 = vcmask 130048  }
  0x15   :  { %v303_v14 = vld [vmem:[%s1492_s3 + $0x30] sm:$0xff]  ;;  %v304_v16 = vld [vmem:[%s1492_s3 + $0x38] sm:$0xff]  ;;  %v57_v17 = vld [vmem:[%s1490_s1 + $0x8] sm:$0xff]  ;;  %969 = vmatprep.subr.bf16.mxu0 %v1062_v34  ;;  %977 = vmatprep.subr.bf16.mxu1 %v1062_v34  ;;  %vm537_vm1 = vcmask 1041409   ;;  %vm539_vm2 = vcmask 1042434   ;;  %vm541_vm3 = vcmask 1043459  }
  0x16   :  { %380 = vperm.xlu1 %1013, %v310_v11   ;;  %v56_v18 = vld [vmem:[%s1490_s1] sm:$0xff]  ;;  %v65_v19 = vld [vmem:[%s1490_s1 + $0x48] sm:$0xff]  ;;  %v66_v21 = vld [vmem:[%s1490_s1 + $0x50] sm:$0xff]  ;;  %vm543_vm4 = vcmask 1044484   ;;  %vm545_vm5 = vcmask 1045509   ;;  %vm547_vm6 = vcmask 1046534  }
  0x17   :  { %340 = vperm.xlu0 %1012, %v302_v12   ;;  %v64_v20 = vld [vmem:[%s1490_s1 + $0x40] sm:$0xff]  ;;  %v58_v22 = vld [vmem:[%s1490_s1 + $0x10] sm:$0xff]  ;;  %v67_v23 = vld [vmem:[%s1490_s1 + $0x58] sm:$0xff]  ;;  %vm549_vm7 = vcmask 1047559   ;;  %s1063_s20 = smov 16   ;;  %vm1064_vm8 = vmmov 0  }
  0x18   :  { %v59_v24 = vld [vmem:[%s1490_s1 + $0x18] sm:$0xff]  ;;  %v68_v25 = vld [vmem:[%s1490_s1 + $0x60] sm:$0xff]  ;;  %v69_v27 = vld [vmem:[%s1490_s1 + $0x68] sm:$0xff]  ;;  %973 = vmatprep.mubr.msk.bf16.mxu0 %vm1064_vm8, %v1062_v34  ;;  %985 = vmatprep.mubr.msk.bf16.mxu1 %vm1064_vm8, %v1062_v34  ;;  %vm615_vm9 = vcmask 261120   ;;  %vm669_vm11 = vcmask 523264  }
  0x19   :  { %v60_v26 = vld [vmem:[%s1490_s1 + $0x20] sm:$0xff]  ;;  %v61_v28 = vld [vmem:[%s1490_s1 + $0x28] sm:$0xff]  ;;  %v70_v29 = vld [vmem:[%s1490_s1 + $0x70] sm:$0xff] }
  0x1a   :  { %385 = vperm.xlu1 %1013, %v311_v13   ;;  %v62_v30 = vld [vmem:[%s1490_s1 + $0x30] sm:$0xff]  ;;  %v71_v31 = vld [vmem:[%s1490_s1 + $0x78] sm:$0xff]  ;;  %v1019_v33 = vld [vmem:[%s1493_s4] sm:$0xff]  }
  0x1b   :  { %345 = vperm.xlu0 %1012, %v303_v14   ;;  %v63_v32 = vld [vmem:[%s1490_s1 + $0x38] sm:$0xff]  ;;  %970 = vmatpush3.bf16.msra.mxu0 %v1019_v33  ;;  %v289_v35 = vld [vmem:[%s1491_s2 + $0x40] sm:$0xff]  ;;  %v290_v41 = vld [vmem:[%s1491_s2 + $0x48] sm:$0xff] }
  0x1c   :  { %971 = vmatprep.subr.bf16.mxu0 %v1062_v34  ;;  %v281_v36 = vld [vmem:[%s1491_s2] sm:$0xff]  ;;  %v282_v42 = vld [vmem:[%s1491_s2 + $0x8] sm:$0xff]  ;;  %v291_v53 = vld [vmem:[%s1491_s2 + $0x50] sm:$0xff] }
  0x1d   :  { %v283_v54 = vld [vmem:[%s1491_s2 + $0x10] sm:$0xff]  ;;  %v292_v5 = vld [vmem:[%s1491_s2 + $0x58] sm:$0xff] }
  0x1e   :  { %390 = vperm.xlu1 %1013, %v312_v15   ;;  %v284_v6 = vld [vmem:[%s1491_s2 + $0x18] sm:$0xff] }
  0x1f   :  { %350 = vperm.xlu0 %1012, %v304_v16  }
  0x22   :  { %79 = vperm.xlu1 %1013, %v57_v17  }
  0x23   :  { %74 = vperm.xlu0 %1012, %v56_v18  }
  0x26   :  { %119 = vperm.xlu1 %1013, %v65_v19  }
  0x27   :  { %114 = vperm.xlu0 %1012, %v64_v20  }
  0x2a   :  { %124 = vperm.xlu1 %1013, %v66_v21  }
  0x2b   :  { %84 = vperm.xlu0 %1012, %v58_v22  }
  0x2e   :  { %129 = vperm.xlu1 %1013, %v67_v23   ;;  %v293_v23 = vld [vmem:[%s1491_s2 + $0x60] sm:$0xff] }
  0x2f   :  { %89 = vperm.xlu0 %1012, %v59_v24   ;;  %v285_v24 = vld [vmem:[%s1491_s2 + $0x20] sm:$0xff] }
  0x32   :  { %134 = vperm.xlu1 %1013, %v68_v25  }
  0x33   :  { %94 = vperm.xlu0 %1012, %v60_v26  }
  0x36   :  { %139 = vperm.xlu1 %1013, %v69_v27  }
  0x37   :  { %99 = vperm.xlu0 %1012, %v61_v28  }
  0x3a   :  { %144 = vperm.xlu1 %1013, %v70_v29  }
  0x3b   :  { %104 = vperm.xlu0 %1012, %v62_v30  }
  0x3e   :  { %149 = vperm.xlu1 %1013, %v71_v31  }
  0x3f   :  { %109 = vperm.xlu0 %1012, %v63_v32  }
  0x81   :  { %v356_v37 = vpop.permute.xlu1 %355 }
  0x82   :  { %v316_v38 = vpop.permute.xlu0 %315  ;;  %v401_v39 = vmul.f32 %v356_v37, %v289_v35 }
  0x83   :  { %v393_v40 = vmul.f32 %v316_v38, %v281_v36 }
  0x84   :  { %v465_v43 = vsel %vm168_vm0, %v401_v39, 0.0 }
  0x85   :  { %v409_v44 = vsel %vm168_vm0, %v393_v40, 0.0  ;;  %v466_v45 = vrot.slane %v465_v43, 4  ;;  %v361_v47 = vpop.permute.xlu1 %360 }
  0x86   :  { %v410_v46 = vrot.slane %v409_v44, 4  ;;  %v321_v48 = vpop.permute.xlu0 %320  ;;  %v402_v49 = vmul.f32 %v361_v47, %v290_v41 }
  0x87   :  { %v394_v50 = vmul.f32 %v321_v48, %v282_v42  ;;  %v467_v51 = vadd.f32 %v466_v45, %v465_v43  ;;  %v294_v48 = vld [vmem:[%s1491_s2 + $0x68] sm:$0xff] }
  0x88   :  { %v411_v52 = vadd.f32 %v410_v46, %v409_v44  ;;  %v472_v55 = vsel %vm168_vm0, %v402_v49, 0.0  ;;  %v286_v49 = vld [vmem:[%s1491_s2 + $0x28] sm:$0xff] }
  0x89   :  { %v416_v56 = vsel %vm168_vm0, %v394_v50, 0.0  ;;  %v468_v57 = vrot.slane %v467_v51, 2  ;;  %v473_v59 = vrot.slane %v472_v55, 4  ;;  %v366_v61 = vpop.permute.xlu1 %365 }
  0x8a   :  { %v412_v58 = vrot.slane %v411_v52, 2  ;;  %v417_v60 = vrot.slane %v416_v56, 4  ;;  %v326_v62 = vpop.permute.xlu0 %325  ;;  %v403_v63 = vmul.f32 %v366_v61, %v291_v53 }
  0x8b   :  { %v395_v0 = vmul.f32 %v326_v62, %v283_v54  ;;  %v469_v1 = vadd.f32 %v468_v57, %v467_v51  ;;  %v474_v3 = vadd.f32 %v473_v59, %v472_v55 }
  0x8c   :  { %v413_v2 = vadd.f32 %v412_v58, %v411_v52  ;;  %v418_v4 = vadd.f32 %v417_v60, %v416_v56  ;;  %v479_v7 = vsel %vm168_vm0, %v403_v63, 0.0 }
  0x8d   :  { %v423_v8 = vsel %vm168_vm0, %v395_v0, 0.0  ;;  %v470_v9 = vrot.slane %v469_v1, 1  ;;  %v475_v11 = vrot.slane %v474_v3, 2  ;;  %v371_v13 = vpop.permute.xlu1 %370  ;;  %v480_v15 = vrot.slane %v479_v7, 4 }
  0x8e   :  { %v414_v10 = vrot.slane %v413_v2, 1  ;;  %v419_v12 = vrot.slane %v418_v4, 2  ;;  %v331_v14 = vpop.permute.xlu0 %330  ;;  %v424_v16 = vrot.slane %v423_v8, 4  ;;  %v404_v17 = vmul.f32 %v371_v13, %v292_v5 }
  0x8f   :  { %v396_v18 = vmul.f32 %v331_v14, %v284_v6  ;;  %v471_v19 = vadd.f32 %v470_v9, %v469_v1  ;;  %v476_v21 = vadd.f32 %v475_v11, %v474_v3  ;;  %v481_v25 = vadd.f32 %v480_v15, %v479_v7 }
  0x90   :  { %v415_v20 = vadd.f32 %v414_v10, %v413_v2  ;;  %v420_v22 = vadd.f32 %v419_v12, %v418_v4  ;;  %v425_v26 = vadd.f32 %v424_v16, %v423_v8  ;;  %v486_v27 = vsel %vm168_vm0, %v404_v17, 0.0  ;;  %v295_v8 = vld [vmem:[%s1491_s2 + $0x70] sm:$0xff] }
  0x91   :  { %v430_v28 = vsel %vm168_vm0, %v396_v18, 0.0  ;;  %v477_v29 = vrot.slane %v476_v21, 1  ;;  %v487_v31 = vrot.slane %v486_v27, 4  ;;  %v376_v33 = vpop.permute.xlu1 %375  ;;  %v482_v36 = vrot.slane %v481_v25, 2  ;;  %v287_v10 = vld [vmem:[%s1491_s2 + $0x30] sm:$0xff] }
  0x92   :  { %v421_v30 = vrot.slane %v420_v22, 1  ;;  %v431_v32 = vrot.slane %v430_v28, 4  ;;  %v336_v35 = vpop.permute.xlu0 %335  ;;  %v426_v37 = vrot.slane %v425_v26, 2  ;;  %v405_v38 = vmul.f32 %v376_v33, %v293_v23 }
  0x93   :  { %v397_v39 = vmul.f32 %v336_v35, %v285_v24  ;;  %v478_v40 = vadd.f32 %v477_v29, %v476_v21  ;;  %v488_v42 = vadd.f32 %v487_v31, %v486_v27  ;;  %v483_v44 = vadd.f32 %v482_v36, %v481_v25 }
  0x94   :  { %v422_v41 = vadd.f32 %v421_v30, %v420_v22  ;;  %v432_v43 = vadd.f32 %v431_v32, %v430_v28  ;;  %v427_v45 = vadd.f32 %v426_v37, %v425_v26  ;;  %v493_v46 = vsel %vm168_vm0, %v405_v38, 0.0  ;;  %v296_v28 = vld [vmem:[%s1491_s2 + $0x78] sm:$0xff] }
  0x95   :  { %v437_v47 = vsel %vm168_vm0, %v397_v39, 0.0  ;;  %v583_v50 = vsel %vm537_vm1, %v478_v40, %v471_v19  ;;  %v489_v52 = vrot.slane %v488_v42, 2  ;;  %v381_v54 = vpop.permute.xlu1 %380  ;;  %v484_v56 = vrot.slane %v483_v44, 1  ;;  %v288_v30 = vld [vmem:[%s1491_s2 + $0x38] sm:$0xff] }
  0x96   :  { %v576_v51 = vsel %vm537_vm1, %v422_v41, %v415_v20  ;;  %v433_v53 = vrot.slane %v432_v43, 2  ;;  %v341_v55 = vpop.permute.xlu0 %340  ;;  %v428_v57 = vrot.slane %v427_v45, 1  ;;  %v494_v58 = vrot.slane %v493_v46, 4  ;;  %v41_v41 = vld [vmem:[%s1489_s0 + $0x8] sm:$0xff] }
  0x97   :  { %v438_v59 = vrot.slane %v437_v47, 4  ;;  %v490_v60 = vadd.f32 %v489_v52, %v488_v42  ;;  %v406_v62 = vmul.f32 %v381_v54, %v294_v48  ;;  %v398_v63 = vmul.f32 %v341_v55, %v286_v49  ;;  %v40_v42 = vld [vmem:[%s1489_s0] sm:$0xff] }
  0x98   :  { %v434_v61 = vadd.f32 %v433_v53, %v432_v43  ;;  %v485_v0 = vadd.f32 %v484_v56, %v483_v44  ;;  %v429_v1 = vadd.f32 %v428_v57, %v427_v45  ;;  %v495_v2 = vadd.f32 %v494_v58, %v493_v46 }
  0x99   :  { %v439_v3 = vadd.f32 %v438_v59, %v437_v47  ;;  %v491_v4 = vrot.slane %v490_v60, 1  ;;  %v500_v6 = vsel %vm168_vm0, %v406_v62, 0.0  ;;  %v444_v7 = vsel %vm168_vm0, %v398_v63, 0.0  ;;  %v386_v9 = vpop.permute.xlu1 %385 }
  0x9a   :  { %v435_v5 = vrot.slane %v434_v61, 1  ;;  %v346_v11 = vpop.permute.xlu0 %345  ;;  %v584_v12 = vsel %vm539_vm2, %v485_v0, %v583_v50  ;;  %v577_v13 = vsel %vm539_vm2, %v429_v1, %v576_v51  ;;  %v496_v14 = vrot.slane %v495_v2, 2  ;;  %v49_v1 = vld [vmem:[%s1489_s0 + $0x48] sm:$0xff] }
  0x9b   :  { %v440_v15 = vrot.slane %v439_v3, 2  ;;  %v492_v16 = vadd.f32 %v491_v4, %v490_v60  ;;  %v501_v18 = vrot.slane %v500_v6, 4  ;;  %v445_v19 = vrot.slane %v444_v7, 4 }
  0x9c   :  { %v436_v17 = vadd.f32 %v435_v5, %v434_v61  ;;  %v497_v20 = vadd.f32 %v496_v14, %v495_v2  ;;  %v407_v22 = vmul.f32 %v386_v9, %v295_v8  ;;  %v399_v23 = vmul.f32 %v346_v11, %v287_v10  ;;  %v48_v2 = vld [vmem:[%s1489_s0 + $0x40] sm:$0xff] }
  0x9d   :  { %v441_v21 = vadd.f32 %v440_v15, %v439_v3  ;;  %v1289_v24 = vsel %vm541_vm3, %v492_v16, %v584_v12  ;;  %v502_v26 = vadd.f32 %v501_v18, %v500_v6  ;;  %v446_v27 = vadd.f32 %v445_v19, %v444_v7  ;;  %v391_v29 = vpop.permute.xlu1 %390 }
  0x9e   :  { %v1292_v25 = vsel %vm541_vm3, %v436_v17, %v577_v13  ;;  %v351_v31 = vpop.permute.xlu0 %350  ;;  %v498_v32 = vrot.slane %v497_v20, 1  ;;  %v507_v35 = vsel %vm168_vm0, %v407_v22, 0.0  ;;  %v451_v36 = vsel %vm168_vm0, %v399_v23, 0.0  ;;  %v42_v22 = vld [vmem:[%s1489_s0 + $0x10] sm:$0xff] }
  0x9f   :  { %v442_v33 = vrot.slane %v441_v21, 1  ;;  %v503_v37 = vrot.slane %v502_v26, 2  ;;  %v447_v38 = vrot.slane %v446_v27, 2  ;;  %v508_v39 = vrot.slane %v507_v35, 4 }
  0xa0   :  { %v452_v40 = vrot.slane %v451_v36, 4  ;;  %v1308_v43 = vadd.f32 %v498_v32, %v497_v20  ;;  %v408_v45 = vmul.f32 %v391_v29, %v296_v28  ;;  %v400_v46 = vmul.f32 %v351_v31, %v288_v30 }
  0xa1   :  { %v1310_v44 = vadd.f32 %v442_v33, %v441_v21  ;;  %v504_v47 = vadd.f32 %v503_v37, %v502_v26  ;;  %v448_v48 = vadd.f32 %v447_v38, %v446_v27  ;;  %v509_v49 = vadd.f32 %v508_v39, %v507_v35  ;;  %v80_v51 = vpop.permute.xlu1 %79  ;;  %v50_v21 = vld [vmem:[%s1489_s0 + $0x50] sm:$0xff] }
  0xa2   :  { %v453_v50 = vadd.f32 %v452_v40, %v451_v36  ;;  %v75_v52 = vpop.permute.xlu0 %74  ;;  %v514_v53 = vsel %vm168_vm0, %v408_v45, 0.0  ;;  %v458_v54 = vsel %vm168_vm0, %v400_v46, 0.0  ;;  %v153_v55 = vmul.f32 %v80_v51, %v41_v41  ;;  %v51_v51 = vld [vmem:[%s1489_s0 + $0x58] sm:$0xff] }
  0xa3   :  { %v152_v56 = vmul.f32 %v75_v52, %v40_v42  ;;  %v505_v57 = vrot.slane %v504_v47, 1  ;;  %v449_v58 = vrot.slane %v448_v48, 1  ;;  %v510_v59 = vrot.slane %v509_v49, 2 }
  0xa4   :  { %v454_v60 = vrot.slane %v453_v50, 2  ;;  %v515_v61 = vrot.slane %v514_v53, 4  ;;  %v459_v62 = vrot.slane %v458_v54, 4  ;;  %v176_v63 = vsel %vm168_vm0, %v153_v55, 0.0 }
  0xa5   :  { %v169_v0 = vsel %vm168_vm0, %v152_v56, 0.0  ;;  %v1322_v3 = vadd.f32 %v505_v57, %v504_v47  ;;  %v1324_v4 = vadd.f32 %v449_v58, %v448_v48  ;;  %v511_v5 = vadd.f32 %v510_v59, %v509_v49  ;;  %v120_v7 = vpop.permute.xlu1 %119 }
  0xa6   :  { %v455_v6 = vadd.f32 %v454_v60, %v453_v50  ;;  %v115_v8 = vpop.permute.xlu0 %114  ;;  %v516_v9 = vadd.f32 %v515_v61, %v514_v53  ;;  %v460_v10 = vadd.f32 %v459_v62, %v458_v54  ;;  %v177_v11 = vrot.slane %v176_v63, 4  ;;  %v43_v53 = vld [vmem:[%s1489_s0 + $0x18] sm:$0xff] }
  0xa7   :  { %v170_v12 = vrot.slane %v169_v0, 4  ;;  %v512_v13 = vrot.slane %v511_v5, 1  ;;  %v161_v15 = vmul.f32 %v120_v7, %v49_v1  ;;  %v160_v16 = vmul.f32 %v115_v8, %v48_v2 }
  0xa8   :  { %v456_v14 = vrot.slane %v455_v6, 1  ;;  %v517_v17 = vrot.slane %v516_v9, 2  ;;  %v461_v18 = vrot.slane %v460_v10, 2  ;;  %v178_v19 = vadd.f32 %v177_v11, %v176_v63 }
  0xa9   :  { %v171_v20 = vadd.f32 %v170_v12, %v169_v0  ;;  %v1332_v23 = vadd.f32 %v512_v13, %v511_v5  ;;  %v232_v27 = vsel %vm168_vm0, %v161_v15, 0.0  ;;  %v225_v28 = vsel %vm168_vm0, %v160_v16, 0.0  ;;  %v125_v29 = vpop.permute.xlu1 %124 }
  0xaa   :  { %v1334_v26 = vadd.f32 %v456_v14, %v455_v6  ;;  %v85_v30 = vpop.permute.xlu0 %84  ;;  %v518_v31 = vadd.f32 %v517_v17, %v516_v9  ;;  %v462_v32 = vadd.f32 %v461_v18, %v460_v10  ;;  %v179_v33 = vrot.slane %v178_v19, 2  ;;  %v1020_v14 = vld [vmem:[%s1493_s4 + $0x8] sm:$0xff]  }
  0xab   :  { %v172_v35 = vrot.slane %v171_v20, 2  ;;  %v233_v36 = vrot.slane %v232_v27, 4  ;;  %v226_v37 = vrot.slane %v225_v28, 4  ;;  %v162_v38 = vmul.f32 %v125_v29, %v50_v21  ;;  %972 = vmatpush3.bf16.msra.mxu0 %v1020_v14  ;;  %v52_v29 = vld [vmem:[%s1489_s0 + $0x60] sm:$0xff] }
  0xac   :  { %v154_v39 = vmul.f32 %v85_v30, %v42_v22  ;;  %v519_v40 = vrot.slane %v518_v31, 1  ;;  %v463_v41 = vrot.slane %v462_v32, 1  ;;  %v180_v42 = vadd.f32 %v179_v33, %v178_v19  ;;  %989 = vmatprep.subr.bf16.mxu0 %v1062_v34 }
  0xad   :  { %v173_v45 = vadd.f32 %v172_v35, %v171_v20  ;;  %v234_v46 = vadd.f32 %v233_v36, %v232_v27  ;;  %v227_v47 = vadd.f32 %v226_v37, %v225_v28  ;;  %v239_v48 = vsel %vm168_vm0, %v162_v38, 0.0  ;;  %v130_v50 = vpop.permute.xlu1 %129 }
  0xae   :  { %v183_v49 = vsel %vm168_vm0, %v154_v39, 0.0  ;;  %v90_v52 = vpop.permute.xlu0 %89  ;;  %v520_v54 = vadd.f32 %v519_v40, %v518_v31  ;;  %v464_v55 = vadd.f32 %v463_v41, %v462_v32  ;;  %v181_v56 = vrot.slane %v180_v42, 1 }
  0xaf   :  { %v174_v57 = vrot.slane %v173_v45, 1  ;;  %v235_v58 = vrot.slane %v234_v46, 2  ;;  %v228_v59 = vrot.slane %v227_v47, 2  ;;  %v240_v60 = vrot.slane %v239_v48, 4 }
  0xb0   :  { %v184_v61 = vrot.slane %v183_v49, 4  ;;  %v182_v62 = vadd.f32 %v181_v56, %v180_v42  ;;  %v163_v0 = vmul.f32 %v130_v50, %v51_v51  ;;  %v155_v1 = vmul.f32 %v90_v52, %v43_v53  ;;  %v54_v53 = vld [vmem:[%s1489_s0 + $0x70] sm:$0xff] }
  0xb1   :  { %v175_v63 = vadd.f32 %v174_v57, %v173_v45  ;;  %v236_v2 = vadd.f32 %v235_v58, %v234_v46  ;;  %v229_v5 = vadd.f32 %v228_v59, %v227_v47  ;;  %v241_v6 = vadd.f32 %v240_v60, %v239_v48  ;;  %v135_v8 = vpop.permute.xlu1 %134  ;;  %v53_v47 = vld [vmem:[%s1489_s0 + $0x68] sm:$0xff] }
  0xb2   :  { %v185_v7 = vadd.f32 %v184_v61, %v183_v49  ;;  %v95_v9 = vpop.permute.xlu0 %94  ;;  %v246_v11 = vsel %vm168_vm0, %v163_v0, 0.0  ;;  %v190_v12 = vsel %vm168_vm0, %v155_v1, 0.0  ;;  %v579_v13 = vsel %vm543_vm4, %v1310_v44, %v1292_v25 }
  0xb3   :  { %v538_v10 = vsel %vm537_vm1, %v182_v62, %v175_v63  ;;  %v237_v15 = vrot.slane %v236_v2, 1  ;;  %v230_v16 = vrot.slane %v229_v5, 1  ;;  %v242_v17 = vrot.slane %v241_v6, 2 }
  0xb4   :  { %v186_v18 = vrot.slane %v185_v7, 2  ;;  %v247_v19 = vrot.slane %v246_v11, 4  ;;  %v191_v20 = vrot.slane %v190_v12, 4  ;;  %v580_v21 = vsel %vm545_vm5, %v1324_v4, %v579_v13 }
  0xb5   :  { %v586_v22 = vsel %vm543_vm4, %v1308_v43, %v1289_v24  ;;  %v238_v27 = vadd.f32 %v237_v15, %v236_v2  ;;  %v231_v25 = vadd.f32 %v230_v16, %v229_v5  ;;  %v243_v44 = vadd.f32 %v242_v17, %v241_v6  ;;  %v140_v30 = vpop.permute.xlu1 %139  ;;  %v44_v43 = vld [vmem:[%s1489_s0 + $0x20] sm:$0xff]  ;;  %v55_v15 = vld [vmem:[%s1489_s0 + $0x78] sm:$0xff] }
  0xb6   :  { %v187_v28 = vadd.f32 %v186_v18, %v185_v7  ;;  %v100_v31 = vpop.permute.xlu0 %99  ;;  %v248_v32 = vadd.f32 %v247_v19, %v246_v11  ;;  %v192_v33 = vadd.f32 %v191_v20, %v190_v12  ;;  %v581_v4 = vsel %vm547_vm6, %v1334_v26, %v580_v21  ;;  %v47_v21 = vld [vmem:[%s1489_s0 + $0x38] sm:$0xff] }
  0xb7   :  { %v587_v24 = vsel %vm545_vm5, %v1322_v3, %v586_v22  ;;  %v551_v35 = vsel %vm537_vm1, %v238_v27, %v231_v25  ;;  %v244_v36 = vrot.slane %v243_v44, 1  ;;  %v582_v38 = vsel %vm549_vm7, %v464_v55, %v581_v4  ;;  %v46_v55 = vld [vmem:[%s1489_s0 + $0x30] sm:$0xff] }
  0xb8   :  { %v188_v37 = vrot.slane %v187_v28, 1  ;;  %v249_v39 = vrot.slane %v248_v32, 2  ;;  %v193_v40 = vrot.slane %v192_v33, 2  ;;  %v588_v41 = vsel %vm547_vm6, %v1332_v23, %v587_v24  ;;  %v45_v23 = vld [vmem:[%s1489_s0 + $0x28] sm:$0xff] }
  0xb9   :  { %v164_v42 = vmul.f32 %v135_v8, %v52_v29  ;;  %v245_v26 = vadd.f32 %v244_v36, %v243_v44  ;;  %v589_v3 = vsel %vm549_vm7, %v520_v54, %v588_v41  ;;  %v156_v46 = vmul.f32 %v95_v9, %v44_v43  ;;  %v145_v48 = vpop.permute.xlu1 %144 }
  0xba   :  { %v189_v45 = vadd.f32 %v188_v37, %v187_v28  ;;  %v250_v49 = vadd.f32 %v249_v39, %v248_v32  ;;  %v194_v50 = vadd.f32 %v193_v40, %v192_v33  ;;  %v1014_v51 = vpack.i.bf16 %v589_v3, %v582_v38  ;;  %v105_v54 = vpop.permute.xlu0 %104 }
  0xbb   :  { %v253_v52 = vsel %vm168_vm0, %v164_v42, 0.0  ;;  %v552_v56 = vsel %vm539_vm2, %v245_v26, %v551_v35  ;;  %v197_v59 = vsel %vm168_vm0, %v156_v46, 0.0  ;;  %v165_v63 = vmul.f32 %v140_v30, %v53_v47 }
  0xbc   :  { %v540_v57 = vsel %vm539_vm2, %v189_v45, %v538_v10  ;;  %v254_v58 = vrot.slane %v253_v52, 4  ;;  %v251_v60 = vrot.slane %v250_v49, 1  ;;  %v195_v61 = vrot.slane %v194_v50, 1  ;;  %1015 = vrot.lane.b32.xlu0 %v1014_v51, %s1063_s20 }
  0xbd   :  { %v198_v62 = vrot.slane %v197_v59, 4  ;;  %v157_v1 = vmul.f32 %v100_v31, %v45_v23  ;;  %v166_v2 = vmul.f32 %v145_v48, %v54_v53  ;;  %v158_v5 = vmul.f32 %v105_v54, %v46_v55  ;;  %v150_v14 = vpop.permute.xlu1 %149 }
  0xbe   :  { %v255_v0 = vadd.f32 %v254_v58, %v253_v52  ;;  %v252_v6 = vadd.f32 %v251_v60, %v250_v49  ;;  %v196_v7 = vadd.f32 %v195_v61, %v194_v50  ;;  %v260_v9 = vsel %vm168_vm0, %v165_v63, 0.0  ;;  %v110_v20 = vpop.permute.xlu0 %109 }
  0xbf   :  { %v199_v8 = vadd.f32 %v198_v62, %v197_v59  ;;  %v261_v10 = vrot.slane %v260_v9, 4  ;;  %v204_v12 = vsel %vm168_vm0, %v157_v1, 0.0  ;;  %v267_v13 = vsel %vm168_vm0, %v166_v2, 0.0 }
  0xc0   :  { %v256_v11 = vrot.slane %v255_v0, 2  ;;  %v553_v16 = vsel %vm541_vm3, %v252_v6, %v552_v56  ;;  %v542_v17 = vsel %vm541_vm3, %v196_v7, %v540_v57  ;;  %v205_v19 = vrot.slane %v204_v12, 4 }
  0xc1   :  { %v200_v18 = vrot.slane %v199_v8, 2  ;;  %v262_v27 = vadd.f32 %v261_v10, %v260_v9  ;;  %v268_v25 = vrot.slane %v267_v13, 4  ;;  %v211_v44 = vsel %vm168_vm0, %v158_v5, 0.0 }
  0xc2   :  { %v257_v22 = vadd.f32 %v256_v11, %v255_v0  ;;  %v206_v29 = vadd.f32 %v205_v19, %v204_v12  ;;  %v212_v30 = vrot.slane %v211_v44, 4  ;;  %v167_v31 = vmul.f32 %v150_v14, %v55_v15 }
  0xc3   :  { %v201_v28 = vadd.f32 %v200_v18, %v199_v8  ;;  %v263_v33 = vrot.slane %v262_v27, 2  ;;  %v269_v4 = vadd.f32 %v268_v25, %v267_v13  ;;  %v159_v24 = vmul.f32 %v110_v20, %v47_v21 }
  0xc4   :  { %v258_v32 = vrot.slane %v257_v22, 1  ;;  %v207_v35 = vrot.slane %v206_v29, 2  ;;  %v213_v36 = vadd.f32 %v212_v30, %v211_v44  ;;  %v274_v37 = vsel %vm168_vm0, %v167_v31, 0.0 }
  0xc5   :  { %v202_v43 = vrot.slane %v201_v28, 1  ;;  %v264_v39 = vadd.f32 %v263_v33, %v262_v27  ;;  %v270_v40 = vrot.slane %v269_v4, 2  ;;  %v275_v41 = vrot.slane %v274_v37, 4 }
  0xc6   :  { %v259_v38 = vadd.f32 %v258_v32, %v257_v22  ;;  %v208_v26 = vadd.f32 %v207_v35, %v206_v29  ;;  %v214_v45 = vrot.slane %v213_v36, 2  ;;  %v218_v3 = vsel %vm168_vm0, %v159_v24, 0.0  ;;  %v1022_v35 = vld [vmem:[%s1494_s5 + $0x8] sm:$0xff]  }
  0xc7   :  { %v203_v42 = vadd.f32 %v202_v43, %v201_v28  ;;  %v265_v47 = vrot.slane %v264_v39, 1  ;;  %v271_v48 = vadd.f32 %v270_v40, %v269_v4  ;;  %v276_v49 = vadd.f32 %v275_v41, %v274_v37  ;;  %v1021_v43 = vld [vmem:[%s1494_s5] sm:$0xff]   ;;  %v1024_v37 = vld [vmem:[%s1494_s5 + $0x18] sm:$0xff]  }
  0xc8   :  { %v554_v46 = vsel %vm543_vm4, %v259_v38, %v553_v16  ;;  %v209_v51 = vrot.slane %v208_v26, 1  ;;  %v215_v52 = vadd.f32 %v214_v45, %v213_v36  ;;  %v219_v23 = vrot.slane %v218_v3, 4  ;;  %978 = vmatpush3.bf16.msra.mxu1 %v1021_v43  ;;  %v1023_v36 = vld [vmem:[%s1494_s5 + $0x10] sm:$0xff]  }
  0xc9   :  { %v544_v50 = vsel %vm543_vm4, %v203_v42, %v542_v17  ;;  %v266_v53 = vadd.f32 %v265_v47, %v264_v39  ;;  %v272_v54 = vrot.slane %v271_v48, 1  ;;  %v277_v55 = vrot.slane %v276_v49, 2  ;;  %979 = vmatprep.subr.bf16.mxu1 %v1062_v34 }
  0xca   :  { %v210_v56 = vadd.f32 %v209_v51, %v208_v26  ;;  %v216_v57 = vrot.slane %v215_v52, 1  ;;  %v220_v58 = vadd.f32 %v219_v23, %v218_v3  ;;  %v660_v18 = vlaneseq }
  0xcb   :  { %v555_v59 = vsel %vm545_vm5, %v266_v53, %v554_v46  ;;  %v273_v60 = vadd.f32 %v272_v54, %v271_v48  ;;  %v278_v61 = vadd.f32 %v277_v55, %v276_v49  ;;  %v1025_v54 = vld [vmem:[%s1496_s7] sm:$0xff]   ;;  %v1026_v55 = vld [vmem:[%s1496_s7 + $0x8] sm:$0xff]  }
  0xcc   :  { %v546_v62 = vsel %vm545_vm5, %v210_v56, %v544_v50  ;;  %v217_v63 = vadd.f32 %v216_v57, %v215_v52  ;;  %v221_v0 = vrot.slane %v220_v58, 2  ;;  %v661_v19 = vand.u32 127, %v660_v18  ;;  %980 = vmatpush3.bf16.msra.mxu1 %v1022_v35  ;;  %v941_v56 = vld [vmem:[%s1495_s6] ss:$0 sm:$0xff] }
  0xcd   :  { %v279_v1 = vrot.slane %v278_v61, 1  ;;  %v556_v2 = vsel %vm547_vm6, %v273_v60, %v555_v59  ;;  %981 = vmatprep.subr.bf16.mxu1 %v1062_v34 }
  0xce   :  { %v222_v5 = vadd.f32 %v221_v0, %v220_v58  ;;  %v548_v6 = vsel %vm547_vm6, %v217_v63, %v546_v62  ;;  %vm662_vm10 = vcmp.lt.s32.totalorder %v661_v19, 32 }
  0xcf   :  { %v280_v7 = vadd.f32 %v279_v1, %v278_v61 }
  0xd0   :  { %v223_v8 = vrot.slane %v222_v5, 1  ;;  %982 = vmatpush3.bf16.msra.mxu1 %v1023_v36 }
  0xd1   :  { %v557_v9 = vsel %vm549_vm7, %v280_v7, %v556_v2  ;;  %983 = vmatprep.subr.bf16.mxu1 %v1062_v34  ;;  %v1027_v2 = vld [vmem:[%s1498_s9] sm:$0xff]  }
  0xd2   :  { %v224_v11 = vadd.f32 %v223_v8, %v222_v5  ;;  %v1028_v5 = vld [vmem:[%s1498_s9 + $0x8] sm:$0xff]   ;;  %s1065_s9 = smov [#allocation2]  }
  0xd3   :  { %s927_s20 = sshll.u32 %s1065_s9, 4  ;;  %s928_s20 = int_to_ptr.vmem [resolvable:$true] %s927_s20 }
  0xd4   :  { %v550_v10 = vsel %vm549_vm7, %v224_v11, %v548_v6  ;;  %984 = vmatpush3.bf16.msra.mxu1 %v1024_v37  ;;  %v947_v6 = vld [vmem:[%s1497_s8] ss:$0 sm:$0xff]  ;;  %s1037_s8 = scalar_lea.vmem %s928_s20, 256  ;;  %p1042_p1 = scmp.lt.s32.totalorder %s928_s20, %s928_s20 }
  0xd5   :  { %p1038_p0 = scmp.ne.s32.totalorder %s928_s20, %s1037_s8  ;;  %p1043_p2 = scmp.lt.s32.totalorder %s1037_s8, %s1037_s8 }
  0xd7   :  { %p1044_p3 = por %p1043_p2, %p1042_p1 }
  0xd9   :  { %p1045_p4 = pnand %p1044_p3, %p1038_p0 }
 0x12e   :  { %v1016_v12 = vpop.permute.xlu0 %1015 }
 0x12f   :  { %v1018_v13 = vunpack.i.h.bf16 %v1016_v12  ;;  %v1017_v14 = vunpack.i.l.bf16 %v1016_v12 }
 0x131   :  { %v596_v15 = vsel %vm168_vm0, %v550_v10, %v1017_v14  ;;  %v597_v16 = vsel %vm168_vm0, %v557_v9, %v1018_v13 }
 0x132   :  { %v598_v17 = vpack.c.bf16 %v597_v16, %v596_v15 }
 0x134   :  { %974 = vmatmul.mubr.msk.bf16.vlgmr.msra.gmra.mrb[0].mxu0 %vm615_vm9, %v598_v17 }
 0x135   :  { %993 = vmatprep.mubr.msk.bf16.mxu0 %vm1064_vm8, %v1062_v34  ;;  %990 = vmatpush3.bf16.msra.mxu0 %v1025_v54 }
 0x136   :  { %991 = vmatprep.subr.bf16.mxu0 %v1062_v34 }
 0x139   :  { %992 = vmatpush3.bf16.msra.mxu0 %v1026_v55 }
 0x13a   :  { %997 = vmatprep.subr.bf16.mxu0 %v1062_v34 }
 0x207   :  { %v653_v20 = vpop.f32.mrb[0].mxu0 }
 0x208   :  { %v663_v21 = vmul.f32 %v653_v20, %v653_v20  ;;  %v975_v22 = vpop.f32.mrb[1].mxu0 }
 0x209   :  { %v656_v27 = vpop.f32.mrb[2].mxu0 }
 0x20a   :  { %v664_v25 = vmul.f32 %v656_v27, %v656_v27  ;;  %v976_v44 = vpop.f32.mrb[3].mxu0  ;;  %v667_v28 = vsel %vm662_vm10, %v663_v21, 0.0  ;;  %v676_v33 = vsel %vm662_vm10, 0.0, %v663_v21 }
 0x20b   :  { %v670_v29 = vsel %vm669_vm11, %v667_v28, 0.0  ;;  %v678_v24 = vsel %vm669_vm11, %v676_v33, 0.0 }
 0x20c   :  { %671 = vadd.xlane.f32.xlu1 %v670_v29  ;;  %v668_v30 = vsel %vm662_vm10, %v664_v25, 0.0  ;;  %v677_v31 = vsel %vm662_vm10, 0.0, %v664_v25 }
 0x20d   :  { %v673_v32 = vsel %vm669_vm11, %v668_v30, 0.0  ;;  %v681_v4 = vsel %vm669_vm11, %v677_v31, 0.0 }
 0x20e   :  { %674 = vadd.xlane.f32.xlu0 %v673_v32 }
 0x210   :  { %682 = vadd.xlane.f32.xlu1 %v681_v4 }
 0x212   :  { %679 = vadd.xlane.f32.xlu0 %v678_v24 }
 0x299   :  { %v672_v38 = vpop.xlane.xlu1 %671 }
 0x29a   :  { %v684_v41 = vmax.f32 %v672_v38, 1e-24 }
 0x29b   :  { %v675_v39 = vpop.xlane.xlu0 %674 }
 0x29c   :  { %v685_v40 = vmax.f32 %v675_v39, 1e-24 }
 0x29d   :  { %v683_v42 = vpop.xlane.xlu1 %682 }
 0x29e   :  { %v689_v26 = vmax.f32 %v683_v42, 1e-24  ;;  %1029 = vrsqrt.f32 %v685_v40 }
 0x29f   :  { %v680_v45 = vpop.xlane.xlu0 %679 }
 0x2a0   :  { %1031 = vrsqrt.f32 %v689_v26  ;;  %v688_v3 = vmax.f32 %v680_v45, 1e-24 }
 0x2a1   :  { %1033 = vrsqrt.f32 %v684_v41 }
 0x2a2   :  { %1035 = vrsqrt.f32 %v688_v3 }
 0x2a8   :  { %v1030_v46 = vpop.eup %1029 }
 0x2aa   :  { %v1032_v47 = vpop.eup %1031 }
 0x2ab   :  { %v1034_v48 = vpop.eup %1033  ;;  %v693_v49 = vsel %vm662_vm10, %v1030_v46, %v1032_v47 }
 0x2ac   :  { %v1036_v50 = vpop.eup %1035  ;;  %v695_v23 = vmul.f32 %v693_v49, %v656_v27 }
 0x2ad   :  { %v692_v51 = vsel %vm662_vm10, %v1034_v48, %v1036_v50 }
 0x2ae   :  { %v694_v52 = vmul.f32 %v692_v51, %v653_v20 }
 0x2b0   :  { %v696_v53 = vpack.c.bf16 %v695_v23, %v694_v52 }
 0x2b2   :  { %986 = vmatmul.mubr.msk.bf16.vlgmr.msra.gmra.mrb[0].mxu1 %vm669_vm11, %v696_v53 }
 0x385   :  { %v773_v57 = vpop.f32.mrb[0].mxu1 }
 0x386   :  { %v774_v58 = vadd.f32 %v941_v56, %v773_v57  ;;  %v987_v59 = vpop.f32.mrb[1].mxu1 }
 0x387   :  { %v776_v60 = vpop.f32.mrb[2].mxu1 }
 0x388   :  { %v777_v61 = vadd.f32 %v941_v56, %v776_v60  ;;  %v988_v62 = vpop.f32.mrb[3].mxu1  ;;  %v780_v63 = vmax.f32 %v774_v58, 0.0 }
 0x38a   :  { %v781_v0 = vmax.f32 %v777_v61, 0.0 }
 0x38c   :  { %v782_v1 = vpack.c.bf16 %v781_v0, %v780_v63 }
 0x38e   :  { %994 = vmatmul.mubr.msk.bf16.vlgmr.msra.gmra.mrb[4].mxu0 %vm615_vm9, %v782_v1 }
 0x38f   :  { %1001 = vmatprep.mubr.msk.bf16.mxu0 %vm1064_vm8, %v1062_v34  ;;  %998 = vmatpush3.bf16.msra.mxu0 %v1027_v2 }
 0x390   :  { %999 = vmatprep.subr.bf16.mxu0 %v1062_v34  ;;  %v951_v34 = vld [vmem:[%s1499_s10] ss:$0 sm:$0xff] }
 0x393   :  { %1000 = vmatpush3.bf16.msra.mxu0 %v1028_v5 }
 0x461   :  { %v843_v7 = vpop.f32.mrb[4].mxu0 }
 0x462   :  { %v844_v8 = vadd.f32 %v947_v6, %v843_v7  ;;  %v995_v9 = vpop.f32.mrb[5].mxu0 }
 0x463   :  { %v846_v11 = vpop.f32.mrb[6].mxu0 }
 0x464   :  { %v847_v10 = vadd.f32 %v947_v6, %v846_v11  ;;  %v996_v12 = vpop.f32.mrb[7].mxu0  ;;  %v850_v13 = vmax.f32 %v844_v8, 0.0 }
 0x466   :  { %v851_v14 = vmax.f32 %v847_v10, 0.0 }
 0x468   :  { %v852_v15 = vpack.c.bf16 %v851_v14, %v850_v13 }
 0x46a   :  { %1002 = vmatmul.mubr.msk.bf16.vlgmr.msra.gmra.mrb[8].mxu0 %vm615_vm9, %v852_v15 }
 0x53d   :  { %v913_v16 = vpop.f32.mrb[8].mxu0 }
 0x53e   :  { %v914_v17 = vadd.f32 %v951_v34, %v913_v16  ;;  %v1003_v18 = vpop.f32.mrb[9].mxu0 }
 0x53f   :  { %v916_v19 = vpop.f32.mrb[10].mxu0 }
 0x540   :  { %920 = vst [vmem:[#allocation2] sm:$0xff] %v914_v17  ;;  %v917_v20 = vadd.f32 %v951_v34, %v916_v19  ;;  %v1004_v21 = vpop.f32.mrb[11].mxu0 }
 0x542   :  { %921 = vst [vmem:[#allocation2 + $0x8] sm:$0xff] %v917_v20 }
 0x543   :  { %1048 = shalt.err (!%p1045_p4)
}
 0x544   :  { %s1049_s22 = scalar_lea.hbm %s1500_s11, 256 }
 0x545   :  { %p1050_p5 = scmp.ne.s32.totalorder %s1500_s11, %s1049_s22  ;;  %p1053_p6 = scmp.lt.u32.totalorder %s1049_s22, %s1500_s11 }
 0x547   :  { %p1055_p7 = pnand %p1053_p6, %p1050_p5 }
 0x549   :  { %1058 = shalt.err (!%p1055_p7)
}
 0x54a   :  { %s1066_s26 = smov 128   ;;  %s1067_s1 = smov 8  }
 0x54b   :  { %933 = dma.vmem_to_hbm [thread:$0]  %s928_s20, 256, %s1500_s11, [#allocation3], %s1066_s26, %s1066_s26, %s1067_s1  }
 0x54c   :  { %1059 = dma.done.wait [#allocation3], 256  }
 0x54d   :  { %1060 = vsyncadd [#allocation3], 4294967040 }
 0x54e   :  { %937 = vsyncpa [#allocation3], 1 }

</bundles_post_ra>
